<compile_context>
chip_gen: v6e
topology: v6e:2x2x1
jax: 0.10.0
libtpu: 0.0.40
codegen_flags: <defaults>
</compile_context>

<pallas_src>
import functools

import jax
import jax.numpy as jnp
from jax.experimental import pallas as pl
from jax.experimental.pallas import tpu as pltpu


def _merge_heads_kernel(x_ref, w_ref, b_ref, o_ref, acc_ref):
    # x_ref:   (tm, tk)  activation tile
    # w_ref:   (tk, tn)  weight tile (in_features x d_model layout)
    # b_ref:   (1,  tn)  bias tile, pre-cast to float32 in the wrapper
    # o_ref:   (tm, tn)  output tile
    # acc_ref: (tm, tn)  float32 accumulator, resident across the K grid axis
    k = pl.program_id(2)

    @pl.when(k == 0)
    def _():
        # Seed the accumulator with the bias (saves the epilogue add/broadcast).
        acc_ref[...] = jnp.broadcast_to(b_ref[...], acc_ref.shape)

    acc_ref[...] += jnp.dot(
        x_ref[...], w_ref[...], preferred_element_type=jnp.float32
    )

    @pl.when(k == pl.num_programs(2) - 1)
    def _():
        o_ref[...] = acc_ref[...].astype(o_ref.dtype)


def _select_tiles(n_rows, d_model, in_features, dtype_bytes, tm, tn, tk):
    """Static (trace-time) tile selection.  Returns (tm, tn, tk, padded_K)."""
    # Decode / small-M regime: pure weight-streaming; maximize DMA size and
    # minimize per-grid-step overhead.
    if n_rows <= 64:
        big = 2048 if dtype_bytes <= 2 else 1024
        tn = max(tn, big)
        tk = max(tk, big)

    tm_eff = tm if n_rows > tm else n_rows        # full extent when small
    tn_eff = tn if d_model > tn else d_model      # full extent when small

    # Megacore (v7x): if the row axis collapses to one block, split the output
    # column axis into >= 2 lane-dense blocks so both TensorCores get work.
    grid_i = (n_rows + tm_eff - 1) // tm_eff
    if grid_i == 1 and d_model >= 256 and tn_eff >= d_model:
        tn_eff = max(128, ((d_model // 2) // 128) * 128)

    # Reduction tile: a partial K block would feed garbage into the
    # accumulator, so the tile must divide the (possibly zero-padded) K.
    if in_features <= tk:
        tk_eff, k_total = in_features, in_features
    else:
        tk_eff = None
        t = (tk // 128) * 128
        while t >= 128:
            if in_features % t == 0:
                tk_eff = t
                break
            t -= 128
        if tk_eff is None:
            # No clean multiple-of-128 divisor -> zero-pad K in the wrapper.
            tk_eff = tk
            k_total = ((in_features + tk - 1) // tk) * tk
        else:
            k_total = in_features
    return tm_eff, tn_eff, tk_eff, k_total


@functools.partial(
    jax.jit,
    static_argnames=("num_heads", "d_head", "d_model", "tm", "tn", "tk"),
)
def merge_heads(embeddings, weight_t, bias, *, num_heads, d_head, d_model,
                tm=512, tn=1024, tk=1024):
    """embeddings: (..., num_heads, d_head) -> (..., d_model).

    `weight_t` is stored transposed relative to torch's nn.Linear, i.e.
    (num_heads*d_head, d_model).  On v5e, pre-cast embeddings/weight_t to
    bfloat16 for ~2x less HBM traffic; accumulation stays in float32.
    """
    assert embeddings.shape[-2] == num_heads and embeddings.shape[-1] == d_head
    lead_shape = embeddings.shape[:-2]
    in_features = num_heads * d_head

    # Merge head dims and flatten leading dims into rows (pure reshape).
    x2d = embeddings.reshape((-1, in_features))
    n_rows = x2d.shape[0]
    dtype_bytes = jnp.dtype(embeddings.dtype).itemsize

    tm_eff, tn_eff, tk_eff, k_total = _select_tiles(
        n_rows, d_model, in_features, dtype_bytes, tm, tn, tk)

    # Zero-pad the reduction axis if no clean tile divides it; zeros contribute
    # nothing to the float32 accumulator, so this is correctness-free.
    if k_total != in_features:
        pad = k_total - in_features
        x2d = jnp.pad(x2d, ((0, 0), (0, pad)))
        weight_t = jnp.pad(weight_t, ((0, pad), (0, 0)))

    grid = (
        (n_rows + tm_eff - 1) // tm_eff,
        (d_model + tn_eff - 1) // tn_eff,
        k_total // tk_eff,
    )

    # Bias cast hoisted out of the per-step hot path.
    bias_f32 = bias.astype(jnp.float32).reshape((1, d_model))

    # Scoped-VMEM budget derived from the actual double-buffered footprint,
    # capped at 48 MiB (headroom under v7x's 64 MiB physical VMEM).
    tile_bytes = (
        2 * (tm_eff * tk_eff + tk_eff * tn_eff + tm_eff * tn_eff) * dtype_bytes
        + tm_eff * tn_eff * 4          # f32 accumulator scratch
        + 2 * tn_eff * 4               # double-buffered bias tiles
    )
    vmem_limit = int(min(max(tile_bytes + (8 << 20), 32 << 20), 48 << 20))

    out = pl.pallas_call(
        _merge_heads_kernel,
        out_shape=jax.ShapeDtypeStruct((n_rows, d_model), embeddings.dtype),
        grid_spec=pltpu.PrefetchScalarGridSpec(
            num_scalar_prefetch=0,
            grid=grid,
            in_specs=[
                pl.BlockSpec((tm_eff, tk_eff), lambda i, j, k: (i, k)),
                pl.BlockSpec((tk_eff, tn_eff), lambda i, j, k: (k, j)),
                pl.BlockSpec((1, tn_eff), lambda i, j, k: (0, j)),
            ],
            out_specs=pl.BlockSpec((tm_eff, tn_eff), lambda i, j, k: (i, j)),
            scratch_shapes=[pltpu.VMEM((tm_eff, tn_eff), jnp.float32)],
        ),
        compiler_params=pltpu.CompilerParams(
            dimension_semantics=("parallel", "parallel", "arbitrary"),
            vmem_limit_bytes=vmem_limit,
        ),
    )(x2d, weight_t, bias_f32)

    return out.reshape(lead_shape + (d_model,))


def init_merge_heads_params(key, d_model, d_head, num_heads, dtype=jnp.float32):
    """Deterministic init mirroring nn.Linear(d_head*num_heads, d_model)."""
    in_features = d_head * num_heads
    k_w, k_b = jax.random.split(key)
    bound = 1.0 / (in_features ** 0.5)
    # torch stores weight as (d_model, in_features); we keep it transposed.
    weight_t = jax.random.uniform(
        k_w, (in_features, d_model), dtype=dtype, minval=-bound, maxval=bound
    )
    bias = jax.random.uniform(
        k_b, (d_model,), dtype=dtype, minval=-bound, maxval=bound
    )
    return weight_t, bias


def _reference(embeddings, weight_t, bias, num_heads, d_head):
    x = embeddings.reshape(embeddings.shape[:-2] + (num_heads * d_head,))
    return jnp.dot(x, weight_t, precision=jax.lax.Precision.HIGHEST) + bias


def _run_case(key, batch, seq, num_heads, d_head, d_model):
    k_x, k_p = jax.random.split(key)
    embeddings = jax.random.normal(
        k_x, (batch, seq, num_heads, d_head), dtype=jnp.float32)
    weight_t, bias = init_merge_heads_params(k_p, d_model, d_head, num_heads)
    out = merge_heads(embeddings, weight_t, bias,
                      num_heads=num_heads, d_head=d_head, d_model=d_model)
    out = jax.block_until_ready(out)
    ref = _reference(embeddings, weight_t, bias, num_heads, d_head)
    assert out.shape == (batch, seq, d_model), out.shape
    assert jnp.allclose(out, ref, atol=5e-3, rtol=5e-3), (
        float(jnp.max(jnp.abs(out - ref))))
    return out


if __name__ == "__main__":
    key = jax.random.PRNGKey(0)
    k0, k1, k2 = jax.random.split(key, 3)

    # Primary small-shape test (matches the module spec):
    # batch=2, seq=8, heads=4, d_head=8 -> d_model=32.
    _run_case(k0, batch=2, seq=8, num_heads=4, d_head=8, d_model=32)

    # Tiled path: 640 rows -> two row blocks with a masked M edge block.
    _run_case(k1, batch=5, seq=128, num_heads=8, d_head=24, d_model=384)

    # Decode regime + megacore N split: 16 rows, d_model split into 2 blocks.
    _run_case(k2, batch=1, seq=16, num_heads=8, d_head=48, d_model=512)

    print("KERNEL_OK")
</pallas_src>

<mosaic_0001>
module attributes {stable_mosaic.version = 11 : i64} {
  func.func @_merge_heads_kernel(%arg0: i32, %arg1: i32, %arg2: i32, %arg3: memref<16x32xf32, #tpu.memory_space<vmem>>, %arg4: memref<32x32xf32, #tpu.memory_space<vmem>>, %arg5: memref<1x32xf32, #tpu.memory_space<vmem>>, %arg6: memref<16x32xf32, #tpu.memory_space<vmem>>, %arg7: memref<16x32xf32, #tpu.memory_space<vmem>>) attributes {dimension_semantics = [#tpu.dimension_semantics<parallel>, #tpu.dimension_semantics<parallel>, #tpu.dimension_semantics<arbitrary>], iteration_bounds = array<i64: 1, 1, 1>, scalar_prefetch = 0 : i64, scratch_operands = 1 : i64, tpu.core_type = #tpu.core_type<tc>, window_params = [{transform_indices = @transform_0, window_bounds = array<i64: 16, 32>}, {transform_indices = @transform_1, window_bounds = array<i64: 32, 32>}, {transform_indices = @transform_2, window_bounds = array<i64: 1, 32>}, {transform_indices = @transform_3, window_bounds = array<i64: 16, 32>}]} {
    %c0_i32 = arith.constant 0 : i32
    %0 = arith.cmpi eq, %arg2, %c0_i32 : i32
    %1 = arith.extui %0 : i1 to i32
    %c0_i32_0 = arith.constant 0 : i32
    %2 = arith.cmpi ne, %1, %c0_i32_0 : i32
    scf.if %2 {
      %c0_10 = arith.constant 0 : index
      %c0_11 = arith.constant 0 : index
      %12 = vector.load %arg5[%c0_10, %c0_11] : memref<1x32xf32, #tpu.memory_space<vmem>>, vector<1x32xf32>
      %13 = vector.shape_cast %12 : vector<1x32xf32> to vector<1x32xf32>
      %14 = vector.broadcast %13 : vector<1x32xf32> to vector<16x32xf32>
      %c0_12 = arith.constant 0 : index
      %c0_13 = arith.constant 0 : index
      %15 = vector.load %arg7[%c0_12, %c0_13] : memref<16x32xf32, #tpu.memory_space<vmem>>, vector<16x32xf32>
      tpu.vector_store %arg7[%c0_12, %c0_13], %14 {strides = array<i32>} : memref<16x32xf32, #tpu.memory_space<vmem>>, vector<16x32xf32>,
    } else {
    }
    %c0 = arith.constant 0 : index
    %c0_1 = arith.constant 0 : index
    %3 = vector.load %arg7[%c0, %c0_1] : memref<16x32xf32, #tpu.memory_space<vmem>>, vector<16x32xf32>
    %c0_2 = arith.constant 0 : index
    %c0_3 = arith.constant 0 : index
    %4 = vector.load %arg3[%c0_2, %c0_3] : memref<16x32xf32, #tpu.memory_space<vmem>>, vector<16x32xf32>
    %c0_4 = arith.constant 0 : index
    %c0_5 = arith.constant 0 : index
    %5 = vector.load %arg4[%c0_4, %c0_5] : memref<32x32xf32, #tpu.memory_space<vmem>>, vector<32x32xf32>
    %cst = arith.constant dense<0.000000e+00> : vector<16x32xf32>
    %6 = tpu.matmul %4, %5, %cst {dimension_numbers = #tpu.dot_dimension_numbers<[1], [0], [0], [1], [0, 0, 1, 1], [], []>} : vector<16x32xf32>, vector<32x32xf32>, vector<16x32xf32> -> vector<16x32xf32>
    %7 = arith.addf %3, %6 : vector<16x32xf32>
    %c0_6 = arith.constant 0 : index
    %c0_7 = arith.constant 0 : index
    %8 = vector.load %arg7[%c0_6, %c0_7] : memref<16x32xf32, #tpu.memory_space<vmem>>, vector<16x32xf32>
    tpu.vector_store %arg7[%c0_6, %c0_7], %7 {strides = array<i32>} : memref<16x32xf32, #tpu.memory_space<vmem>>, vector<16x32xf32>,
    %c0_i32_8 = arith.constant 0 : i32
    %9 = arith.cmpi eq, %arg2, %c0_i32_8 : i32
    %10 = arith.extui %9 : i1 to i32
    %c0_i32_9 = arith.constant 0 : i32
    %11 = arith.cmpi ne, %10, %c0_i32_9 : i32
    scf.if %11 {
      %c0_10 = arith.constant 0 : index
      %c0_11 = arith.constant 0 : index
      %12 = vector.load %arg7[%c0_10, %c0_11] : memref<16x32xf32, #tpu.memory_space<vmem>>, vector<16x32xf32>
      %c0_12 = arith.constant 0 : index
      %c0_13 = arith.constant 0 : index
      %13 = vector.load %arg6[%c0_12, %c0_13] : memref<16x32xf32, #tpu.memory_space<vmem>>, vector<16x32xf32>
      tpu.vector_store %arg6[%c0_12, %c0_13], %12 {strides = array<i32>} : memref<16x32xf32, #tpu.memory_space<vmem>>, vector<16x32xf32>,
    } else {
    }
    return
  }
  func.func @transform_0(%arg0: i32, %arg1: i32, %arg2: i32) -> (i32, i32) {
    %c0_i32 = arith.constant 0 : i32
    return %arg0, %arg2 : i32, i32
  }
  func.func @transform_1(%arg0: i32, %arg1: i32, %arg2: i32) -> (i32, i32) {
    %c0_i32 = arith.constant 0 : i32
    return %arg2, %arg1 : i32, i32
  }
  func.func @transform_2(%arg0: i32, %arg1: i32, %arg2: i32) -> (i32, i32) {
    %c0_i32 = arith.constant 0 : i32
    %c0_i32_0 = arith.constant 0 : i32
    return %c0_i32, %arg1 : i32, i32
  }
  func.func @transform_3(%arg0: i32, %arg1: i32, %arg2: i32) -> (i32, i32) {
    %c0_i32 = arith.constant 0 : i32
    return %arg0, %arg1 : i32, i32
  }
}

</mosaic_0001>

<bundles_post_ra>
// kernel: merge_heads.1
= control target key start
LH: loop header
LB: loop body
LE: loop exit
PB: predicated region body
PF: predicated region fallthrough
CT: control target
= control target key end

     0   :  { %vm26_vm0 = vcmask 261120   ;;  %s246_s0 = inlined_call_operand.vmem [shape: f32[16,32], index: 0, kind: input, shape index: {}]   ;;  %s247_s1 = inlined_call_operand.vmem [shape: f32[32,32], index: 1, kind: input, shape index: {}]   ;;  %s248_s2 = inlined_call_operand.vmem [shape: f32[1,32], index: 2, kind: input, shape index: {}]   ;;  %s249_s3 = inlined_call_operand.hbm [shape: f32[16,32], index: 3, kind: output, shape index: {}]  }
   0x1   :  { %v36_v0 = vld [vmem:[%s247_s1 + $0x18] sm:$0xff]  ;;  %v35_v1 = vld [vmem:[%s247_s1 + $0x10] sm:$0xff]  ;;  %v31_v2 = vld [vmem:[%s246_s0] sm:$0xff] }
   0x2   :  { %155 = vmatprep.subr.mxu0 %v36_v0  ;;  %v34_v3 = vld [vmem:[%s247_s1 + $0x8] sm:$0xff]  ;;  %163 = vmatprep.mubr.msk.f32.mxu0 %vm26_vm0, %v31_v2  ;;  %v146_v4 = vld [vmem:[%s248_s2] ss:$0 sm:$0xff] }
   0x3   :  { %156 = vmatpush3.msra.mxu0 %v36_v0 }
   0x4   :  { %8 = vsyncpa [#allocation4], 0  ;;  %157 = vmatprep.subr.mxu0 %v35_v1  ;;  %28 = vst.msk [vmem:[#allocation2 + $0x8] sm:$0xff] %vm26_vm0, %v146_v4  ;;  %v33_v5 = vld [vmem:[%s247_s1] sm:$0xff]  ;;  %v32_v6 = vld [vmem:[%s246_s0 + $0x8] sm:$0xff]  ;;  %s191_s1 = smov [#allocation3]  }
   0x5   :  { %27 = vst.msk [vmem:[#allocation2] sm:$0xff] %vm26_vm0, %v146_v4  ;;  %158 = vmatpush3.msra.mxu0 %v35_v1  ;;  %s135_s2 = sshll.u32 %s191_s1, 4  ;;  %s136_s2 = int_to_ptr.vmem [resolvable:$true] %s135_s2 }
   0x6   :  { %159 = vmatprep.subr.mxu0 %v34_v3  ;;  %s169_s0 = scalar_lea.vmem %s136_s2, 256  ;;  %p174_p1 = scmp.lt.s32.totalorder %s136_s2, %s136_s2 }
   0x7   :  { %160 = vmatpush3.msra.mxu0 %v34_v3  ;;  %p170_p0 = scmp.ne.s32.totalorder %s136_s2, %s169_s0  ;;  %p175_p2 = scmp.lt.s32.totalorder %s169_s0, %s169_s0 }
   0x8   :  { %161 = vmatprep.subr.mxu0 %v33_v5 }
   0x9   :  { %162 = vmatpush3.msra.mxu0 %v33_v5  ;;  %p176_p3 = por %p175_p2, %p174_p1 }
   0xa   :  { %164 = vmatmul.mubr.msk.f32.vlgmr.msra.gmra.mxu0 %vm26_vm0, %v32_v6 }
   0xb   :  { %v30_v7 = vld [vmem:[#allocation2 + $0x8] sm:$0xff]  ;;  %p177_p4 = pnand %p176_p3, %p170_p0 }
   0xc   :  { %v29_v9 = vld [vmem:[#allocation2] sm:$0xff] }
  0xca   :  { %v165_v8 = vpop.f32.mrf.mxu0 }
  0xcb   :  { %v120_v10 = vadd.f32 %v165_v8, %v30_v7 }
  0xcc   :  { %v110_v11 = vpop.f32.mrf.mxu0 }
  0xcd   :  { %122 = vst.msk [vmem:[#allocation2 + $0x8] sm:$0xff] %vm26_vm0, %v120_v10  ;;  %v119_v12 = vadd.f32 %v110_v11, %v29_v9 }
  0xcf   :  { %121 = vst.msk [vmem:[#allocation2] sm:$0xff] %vm26_vm0, %v119_v12 }
  0xd4   :  { %v127_v13 = vld [vmem:[#allocation2 + $0x8] sm:$0xff] }
  0xd5   :  { %129 = vst.msk [vmem:[#allocation3 + $0x8] sm:$0xff] %vm26_vm0, %v127_v13 }
  0xd6   :  { %v126_v14 = vld [vmem:[#allocation2] sm:$0xff] }
  0xd7   :  { %128 = vst.msk [vmem:[#allocation3] sm:$0xff] %vm26_vm0, %v126_v14 }
  0xd8   :  { %180 = shalt.err (!%p177_p4)
}
  0xd9   :  { %s192_s26 = smov 128   ;;  %s193_s27 = smov 8  }
  0xda   :  { %141 = dma.vmem_to_hbm [thread:$0]  %s136_s2, 256, %s249_s3, [#allocation4], %s192_s26, %s192_s26, %s193_s27  }
  0xdb   :  { %189 = dma.done.wait [#allocation4], 256  }
  0xdc   :  { %190 = vsyncadd [#allocation4], 4294967040 }
  0xdd   :  { %145 = vsyncpa [#allocation4], 1 }

</bundles_post_ra>
